<compile_context>
chip_gen: v7x
topology: tpu7x:2x2x1
jax: 0.10.0
libtpu: 0.0.40
codegen_flags: <defaults>
</compile_context>

<pallas_src>
import math
from functools import partial

import numpy as np
import jax
import jax.numpy as jnp
from jax import lax
from jax.experimental import pallas as pl
from jax.experimental.pallas import tpu as pltpu

# ------------------------- ModelArgs (small, synthetic) -------------------------
DIM = 32
N_HEADS = 4
N_KV_HEADS = 2                     # GQA: n_rep = 2 (repeat_kv folded into weights)
N_REP = N_HEADS // N_KV_HEADS
HEAD_DIM = DIM // N_HEADS          # 8
HALF = HEAD_DIM // 2               # 4
N_LAYERS = 2
VOCAB = 128
MAX_SEQ = 16
MULTIPLE_OF = 128
EPS = 1e-5
ROPE_THETA = 10000.0
PAD_ID = 0


def ffn_hidden(dim, multiple_of=MULTIPLE_OF):
    hidden = 4 * dim
    hidden = int(2 * hidden / 3)
    return multiple_of * ((hidden + multiple_of - 1) // multiple_of)


HIDDEN = ffn_hidden(DIM)           # 128


def _squeezed():
    # explicit "squeezed" marker for size-1 block dims (falls back to None on older jax)
    return pl.Squeezed() if hasattr(pl, "Squeezed") else None


# ------------------------------- fused Pallas kernel --------------------------------


def fused_forward_kernel(emb_ref, cosf_ref, sinf_ref, mask_ref,
                         attn_norm_ref, wqkv_ref, wo_ref,
                         mlp_norm_ref, w13_ref, w2_ref,
                         final_norm_ref, wlm_ref, out_ref):
    x = emb_ref[...]                              # (L, D) — this batch row's embeddings
    L = x.shape[0]
    cosf = cosf_ref[...][None]                    # (1, L, HEAD_DIM) = [c | c]
    sinf = sinf_ref[...][None]                    # (1, L, HEAD_DIM) = [-s | s]
    mk = mask_ref[...][None]                      # (1, L, L)
    scale = 1.0 / math.sqrt(HEAD_DIM)

    h = x
    for l in range(N_LAYERS):                     # reference feeds `embedds` to every layer
        xl = x

        # ---- attention_norm (RMSNorm) ----
        g = attn_norm_ref[l]                      # (1, D)
        xn = xl * lax.rsqrt(jnp.mean(xl * xl, axis=-1, keepdims=True) + EPS) * g

        # ---- fused Q/K/V projection: ONE lane-dense (L, D) @ (D, 96) matmul ----
        qkv = jnp.dot(xn, wqkv_ref[l], preferred_element_type=jnp.float32)   # (L, 96)
        q = qkv[:, 0:DIM]                         # 32-lane aligned slices
        k = qkv[:, DIM:2 * DIM]
        v = qkv[:, 2 * DIM:3 * DIM]

        # ---- split heads (leading-axis stack of 8-lane slices; no tiled-dim reshape) ----
        qh = jnp.stack([q[:, hh * HEAD_DIM:(hh + 1) * HEAD_DIM] for hh in range(N_HEADS)], axis=0)
        kh = jnp.stack([k[:, hh * HEAD_DIM:(hh + 1) * HEAD_DIM] for hh in range(N_HEADS)], axis=0)
        vh = jnp.stack([v[:, hh * HEAD_DIM:(hh + 1) * HEAD_DIM] for hh in range(N_HEADS)], axis=0)

        # ---- RoPE, rotate-half form on the de-interleaved [real | imag] basis ----
        qh = qh * cosf + jnp.concatenate([qh[..., HALF:], qh[..., :HALF]], axis=-1) * sinf
        kh = kh * cosf + jnp.concatenate([kh[..., HALF:], kh[..., :HALF]], axis=-1) * sinf

        # ---- scores: ONE batched einsum over the full HEAD_DIM contraction ----
        scores = jnp.einsum('hld,hmd->hlm', qh, kh,
                            preferred_element_type=jnp.float32) * scale + mk    # (H, L, L)

        # ---- softmax (reciprocal on the EUP slot) ----
        m = jnp.max(scores, axis=-1, keepdims=True)
        p = jnp.exp(scores - m)
        p = p * pl.reciprocal(jnp.sum(p, axis=-1, keepdims=True), approx=True)

        # ---- attention output, pack heads back to (L, D), single out-proj matmul ----
        attn = jnp.einsum('hlm,hmd->hld', p, vh,
                          preferred_element_type=jnp.float32)                   # (H, L, hd)
        attn2d = jnp.concatenate([attn[hh] for hh in range(N_HEADS)], axis=-1)  # (L, D)
        h = xl + jnp.dot(attn2d, wo_ref[l], preferred_element_type=jnp.float32)

        # ---- mlp_norm (RMSNorm) + SwiGLU MLP + residual ----
        g2 = mlp_norm_ref[l]
        hn = h * lax.rsqrt(jnp.mean(h * h, axis=-1, keepdims=True) + EPS) * g2
        a = jnp.dot(hn, w13_ref[l], preferred_element_type=jnp.float32)         # (L, 2*HIDDEN)
        a1 = a[:, :HIDDEN]
        a3 = a[:, HIDDEN:]
        act = a1 * pl.reciprocal(1.0 + jnp.exp(-a1), approx=True) * a3          # silu(w1 x)*(w3 x)
        h = h + jnp.dot(act, w2_ref[l], preferred_element_type=jnp.float32)

    # ---- final RMSNorm + lm_head (lane-dense 128-wide output) ----
    gf = final_norm_ref[...]
    hn = h * lax.rsqrt(jnp.mean(h * h, axis=-1, keepdims=True) + EPS) * gf
    out_ref[...] = jnp.dot(hn, wlm_ref[...], preferred_element_type=jnp.float32)


# ------------------------------- Pallas wrapper --------------------------------


def fused_forward(emb, cosf, sinf, mask, kp):
    B, L, D = emb.shape
    return pl.pallas_call(
        fused_forward_kernel,
        out_shape=jax.ShapeDtypeStruct((B, L, VOCAB), jnp.float32),
        grid=(B,),
        in_specs=[
            pl.BlockSpec((_squeezed(), L, D), lambda b: (b, 0, 0)),                     # emb
            pl.BlockSpec((L, HEAD_DIM), lambda b: (0, 0)),                              # cos_full
            pl.BlockSpec((L, HEAD_DIM), lambda b: (0, 0)),                              # sin_signed
            pl.BlockSpec((L, L), lambda b: (0, 0)),                                     # mask
            pl.BlockSpec((N_LAYERS, 1, D), lambda b: (0, 0, 0)),                        # attn_norm
            pl.BlockSpec((N_LAYERS, D, 3 * D), lambda b: (0, 0, 0)),                    # wqkv (D,96)
            pl.BlockSpec((N_LAYERS, D, D), lambda b: (0, 0, 0)),                        # wo
            pl.BlockSpec((N_LAYERS, 1, D), lambda b: (0, 0, 0)),                        # mlp_norm
            pl.BlockSpec((N_LAYERS, D, 2 * HIDDEN), lambda b: (0, 0, 0)),               # w13
            pl.BlockSpec((N_LAYERS, HIDDEN, D), lambda b: (0, 0, 0)),                   # w2
            pl.BlockSpec((1, D), lambda b: (0, 0)),                                     # final_norm
            pl.BlockSpec((D, VOCAB), lambda b: (0, 0)),                                 # wlm
        ],
        out_specs=pl.BlockSpec((_squeezed(), L, VOCAB), lambda b: (b, 0, 0)),
        # "parallel" batch axis: each of the two v7x TensorCores gets one batch row;
        # on v5e/v6e it is simply a 2-step serial loop (negligible overhead at B=2).
        compiler_params=pltpu.CompilerParams(dimension_semantics=("parallel",)),
    )(emb, cosf, sinf, mask,
      kp["attn_norm"], kp["wqkv"], kp["wo"],
      kp["mlp_norm"], kp["w13"], kp["w2"],
      kp["final_norm"], kp["wlm"])


# ------------------------------ model glue (JAX) --------------------------------


def precompute_freqs_cis(dim, end, theta):
    freqs = 1.0 / (theta ** (jnp.arange(0, dim, 2)[: dim // 2].astype(jnp.float32) / dim))
    t = jnp.arange(end, dtype=jnp.float32)
    f = jnp.outer(t, freqs)
    return jnp.cos(f), jnp.sin(f)


@partial(jax.jit, static_argnames=("start_pos",))
def kanama_forward(kparams, tokens, start_pos=0):
    B, L = tokens.shape
    emb = kparams["embedding"][tokens]                       # (B, L, D) embedding gather (glue)
    cos = kparams["cos"][start_pos:start_pos + L]            # (L, HALF)
    sin = kparams["sin"][start_pos:start_pos + L]
    cos_full = jnp.concatenate([cos, cos], axis=-1)          # (L, HEAD_DIM) = [c | c]
    sin_signed = jnp.concatenate([-sin, sin], axis=-1)       # (L, HEAD_DIM) = [-s | s]
    if L > 1:
        mask = jnp.triu(jnp.full((L, L), -jnp.inf, dtype=jnp.float32), k=1)
    else:
        mask = jnp.zeros((L, L), jnp.float32)
    # TODO(synk): start_pos>0 decode path (KV-cache read of earlier positions) not implemented;
    #             kernel covers the start_pos=0 prefill case where cache == fresh k/v.
    return fused_forward(emb, cos_full, sin_signed, mask, kparams)


# ------------------------- deterministic parameter init -------------------------


def init_params(key):
    ks = jax.random.split(key, 4 + N_LAYERS)
    emb = 0.02 * jax.random.normal(ks[0], (VOCAB, DIM), jnp.float32)
    emb = emb.at[PAD_ID].set(0.0)                            # padding_idx row
    final_norm = 1.0 + 0.01 * jax.random.normal(ks[1], (DIM,), jnp.float32)
    wlm = 0.02 * jax.random.normal(ks[2], (DIM, VOCAB), jnp.float32)
    cos, sin = precompute_freqs_cis(HEAD_DIM, MAX_SEQ * 2, ROPE_THETA)
    layers = []
    for i in range(N_LAYERS):
        lk = jax.random.split(ks[4 + i], 9)
        layers.append(dict(
            wq=0.02 * jax.random.normal(lk[0], (DIM, N_HEADS * HEAD_DIM), jnp.float32),
            wk=0.02 * jax.random.normal(lk[1], (DIM, N_KV_HEADS * HEAD_DIM), jnp.float32),
            wv=0.02 * jax.random.normal(lk[2], (DIM, N_KV_HEADS * HEAD_DIM), jnp.float32),
            wo=0.02 * jax.random.normal(lk[3], (N_HEADS * HEAD_DIM, DIM), jnp.float32),
            w1=0.02 * jax.random.normal(lk[4], (DIM, HIDDEN), jnp.float32),
            w3=0.02 * jax.random.normal(lk[5], (DIM, HIDDEN), jnp.float32),
            w2=0.02 * jax.random.normal(lk[6], (HIDDEN, DIM), jnp.float32),
            attn_norm=1.0 + 0.01 * jax.random.normal(lk[7], (DIM,), jnp.float32),
            mlp_norm=1.0 + 0.01 * jax.random.normal(lk[8], (DIM,), jnp.float32),
        ))
    return dict(embedding=emb, final_norm=final_norm, wlm=wlm, cos=cos, sin=sin,
                layers=layers)


def to_kernel_params(params):
    # de-interleave RoPE pairs per head: [x0,x1,...,x7] -> [x0,x2,x4,x6, x1,x3,x5,x7]
    perm = np.concatenate([np.arange(0, HEAD_DIM, 2), np.arange(1, HEAD_DIM, 2)])
    wqkv_l, wo_l, w13_l, w2_l, an_l, mn_l = [], [], [], [], [], []
    for lp in params["layers"]:
        wq = np.asarray(lp["wq"])                                   # (D, H*hd)
        wk = np.asarray(lp["wk"])                                   # (D, KV*hd)
        wv = np.asarray(lp["wv"])
        wq_p = wq.reshape(DIM, N_HEADS, HEAD_DIM)[:, :, perm].reshape(DIM, N_HEADS * HEAD_DIM)
        wk_p = np.repeat(wk.reshape(DIM, N_KV_HEADS, HEAD_DIM)[:, :, perm],
                         N_REP, axis=1).reshape(DIM, N_HEADS * HEAD_DIM)     # repeat_kv folded in
        wv_r = np.repeat(wv.reshape(DIM, N_KV_HEADS, HEAD_DIM),
                         N_REP, axis=1).reshape(DIM, N_HEADS * HEAD_DIM)
        wqkv_l.append(np.concatenate([wq_p, wk_p, wv_r], axis=-1))  # (D, 3*H*hd) = (32, 96)
        wo_l.append(np.asarray(lp["wo"]))                           # (D, D)
        w13_l.append(np.concatenate([np.asarray(lp["w1"]), np.asarray(lp["w3"])], axis=-1))
        w2_l.append(np.asarray(lp["w2"]))
        an_l.append(np.asarray(lp["attn_norm"]).reshape(1, DIM))
        mn_l.append(np.asarray(lp["mlp_norm"]).reshape(1, DIM))
    return dict(
        embedding=params["embedding"],
        cos=params["cos"], sin=params["sin"],
        attn_norm=jnp.asarray(np.stack(an_l)),                      # (NL, 1, D)
        wqkv=jnp.asarray(np.stack(wqkv_l)),                         # (NL, D, 96)
        wo=jnp.asarray(np.stack(wo_l)),                             # (NL, D, D)
        mlp_norm=jnp.asarray(np.stack(mn_l)),                       # (NL, 1, D)
        w13=jnp.asarray(np.stack(w13_l)),                           # (NL, D, 2*HIDDEN)
        w2=jnp.asarray(np.stack(w2_l)),                             # (NL, HIDDEN, D)
        final_norm=jnp.asarray(np.asarray(params["final_norm"]).reshape(1, DIM)),
        wlm=params["wlm"])


# --------------------------- pure-JAX reference (check) --------------------------


def _rms(x, w):
    return x * lax.rsqrt(jnp.mean(x * x, axis=-1, keepdims=True) + EPS) * w


def _ref_rope(x, cos, sin):
    # x: (B, L, H, hd) interleaved pairs
    xr = x.reshape(*x.shape[:-1], -1, 2)
    xre, xim = xr[..., 0], xr[..., 1]
    c = cos[None, :, None, :]
    s = sin[None, :, None, :]
    ore = xre * c - xim * s
    oim = xre * s + xim * c
    return jnp.stack([ore, oim], axis=-1).reshape(x.shape)


def ref_forward(params, tokens, start_pos=0):
    with jax.default_matmul_precision("float32"):
        B, L = tokens.shape
        emb = params["embedding"][tokens]
        cos = params["cos"][start_pos:start_pos + L]
        sin = params["sin"][start_pos:start_pos + L]
        mask = jnp.triu(jnp.full((L, L), -jnp.inf, dtype=jnp.float32), k=1)
        h = emb
        for lp in params["layers"]:
            x = emb                                      # reference feeds embedds to every layer
            xn = _rms(x, lp["attn_norm"])
            q = (xn @ lp["wq"]).reshape(B, L, N_HEADS, HEAD_DIM)
            k = (xn @ lp["wk"]).reshape(B, L, N_KV_HEADS, HEAD_DIM)
            v = (xn @ lp["wv"]).reshape(B, L, N_KV_HEADS, HEAD_DIM)
            q = _ref_rope(q, cos, sin)
            k = _ref_rope(k, cos, sin)
            k = jnp.repeat(k, N_REP, axis=2)             # repeat_kv
            v = jnp.repeat(v, N_REP, axis=2)
            q, k, v = (t.transpose(0, 2, 1, 3) for t in (q, k, v))
            scores = jnp.einsum("bhqd,bhkd->bhqk", q, k) / math.sqrt(HEAD_DIM) + mask
            p = jax.nn.softmax(scores, axis=-1)
            o = jnp.einsum("bhqk,bhkd->bhqd", p, v).transpose(0, 2, 1, 3).reshape(B, L, DIM)
            hh = x + o @ lp["wo"]
            hn = _rms(hh, lp["mlp_norm"])
            h = hh + (jax.nn.silu(hn @ lp["w1"]) * (hn @ lp["w3"])) @ lp["w2"]
        hn = _rms(h, params["final_norm"])
        return hn @ params["wlm"]


# -------------------------------------- main -------------------------------------

if __name__ == "__main__":
    key = jax.random.PRNGKey(0)
    pkey, tkey = jax.random.split(key)
    params = init_params(pkey)
    kparams = to_kernel_params(params)

    B, L = 2, 8
    tokens = jax.random.randint(tkey, (B, L), 1, VOCAB)

    logits = kanama_forward(kparams, tokens, start_pos=0)
    logits = jax.block_until_ready(logits)

    ref = ref_forward(params, tokens, start_pos=0)
    np.testing.assert_allclose(np.asarray(logits), np.asarray(ref), rtol=2e-3, atol=5e-4)

    print("KERNEL_OK")
</pallas_src>

<mosaic_0001>
module attributes {stable_mosaic.version = 11 : i64} {
  func.func @fused_forward_kernel(%arg0: i32, %arg1: memref<1x8x32xf32, #tpu.memory_space<vmem>>, %arg2: memref<8x8xf32, #tpu.memory_space<vmem>>, %arg3: memref<8x8xf32, #tpu.memory_space<vmem>>, %arg4: memref<8x8xf32, #tpu.memory_space<vmem>>, %arg5: memref<2x1x32xf32, #tpu.memory_space<vmem>>, %arg6: memref<2x32x96xf32, #tpu.memory_space<vmem>>, %arg7: memref<2x32x32xf32, #tpu.memory_space<vmem>>, %arg8: memref<2x1x32xf32, #tpu.memory_space<vmem>>, %arg9: memref<2x32x256xf32, #tpu.memory_space<vmem>>, %arg10: memref<2x128x32xf32, #tpu.memory_space<vmem>>, %arg11: memref<1x32xf32, #tpu.memory_space<vmem>>, %arg12: memref<32x128xf32, #tpu.memory_space<vmem>>, %arg13: memref<1x8x128xf32, #tpu.memory_space<vmem>>) attributes {dimension_semantics = [#tpu.dimension_semantics<parallel>], iteration_bounds = array<i64: 2>, scalar_prefetch = 0 : i64, scratch_operands = 0 : i64, tpu.core_type = #tpu.core_type<tc>, window_params = [{transform_indices = @transform_0, window_bounds = array<i64: 1, 8, 32>}, {pipeline_mode = #tpu.pipeline_mode<synchronous>, transform_indices = @transform_1, window_bounds = array<i64: 8, 8>}, {pipeline_mode = #tpu.pipeline_mode<synchronous>, transform_indices = @transform_2, window_bounds = array<i64: 8, 8>}, {pipeline_mode = #tpu.pipeline_mode<synchronous>, transform_indices = @transform_3, window_bounds = array<i64: 8, 8>}, {pipeline_mode = #tpu.pipeline_mode<synchronous>, transform_indices = @transform_4, window_bounds = array<i64: 2, 1, 32>}, {pipeline_mode = #tpu.pipeline_mode<synchronous>, transform_indices = @transform_5, window_bounds = array<i64: 2, 32, 96>}, {pipeline_mode = #tpu.pipeline_mode<synchronous>, transform_indices = @transform_6, window_bounds = array<i64: 2, 32, 32>}, {pipeline_mode = #tpu.pipeline_mode<synchronous>, transform_indices = @transform_7, window_bounds = array<i64: 2, 1, 32>}, {pipeline_mode = #tpu.pipeline_mode<synchronous>, transform_indices = @transform_8, window_bounds = array<i64: 2, 32, 256>}, {pipeline_mode = #tpu.pipeline_mode<synchronous>, transform_indices = @transform_9, window_bounds = array<i64: 2, 128, 32>}, {pipeline_mode = #tpu.pipeline_mode<synchronous>, transform_indices = @transform_10, window_bounds = array<i64: 1, 32>}, {pipeline_mode = #tpu.pipeline_mode<synchronous>, transform_indices = @transform_11, window_bounds = array<i64: 32, 128>}, {transform_indices = @transform_12, window_bounds = array<i64: 1, 8, 128>}]} {
    %c0 = arith.constant 0 : index
    %c0_0 = arith.constant 0 : index
    %c0_1 = arith.constant 0 : index
    %0 = vector.load %arg1[%c0, %c0_0, %c0_1] : memref<1x8x32xf32, #tpu.memory_space<vmem>>, vector<1x8x32xf32>
    %1 = vector.shape_cast %0 : vector<1x8x32xf32> to vector<8x32xf32>
    %c0_2 = arith.constant 0 : index
    %c0_3 = arith.constant 0 : index
    %2 = vector.load %arg2[%c0_2, %c0_3] : memref<8x8xf32, #tpu.memory_space<vmem>>, vector<8x8xf32>
    %3 = vector.shape_cast %2 : vector<8x8xf32> to vector<1x8x8xf32>
    %c0_4 = arith.constant 0 : index
    %c0_5 = arith.constant 0 : index
    %4 = vector.load %arg3[%c0_4, %c0_5] : memref<8x8xf32, #tpu.memory_space<vmem>>, vector<8x8xf32>
    %5 = vector.shape_cast %4 : vector<8x8xf32> to vector<1x8x8xf32>
    %c0_6 = arith.constant 0 : index
    %c0_7 = arith.constant 0 : index
    %6 = vector.load %arg4[%c0_6, %c0_7] : memref<8x8xf32, #tpu.memory_space<vmem>>, vector<8x8xf32>
    %7 = vector.shape_cast %6 : vector<8x8xf32> to vector<1x8x8xf32>
    %c1 = arith.constant 1 : index
    %c0_8 = arith.constant 0 : index
    %c0_9 = arith.constant 0 : index
    %8 = vector.load %arg5[%c1, %c0_8, %c0_9] : memref<2x1x32xf32, #tpu.memory_space<vmem>>, vector<1x1x32xf32>
    %9 = vector.shape_cast %8 : vector<1x1x32xf32> to vector<1x32xf32>
    %10 = arith.mulf %1, %1 : vector<8x32xf32>
    %cst = arith.constant dense<0.000000e+00> : vector<8xf32>
    %11 = vector.multi_reduction <add>, %10, %cst [1] : vector<8x32xf32> to vector<8xf32>
    %12 = vector.shape_cast %11 : vector<8xf32> to vector<8x1xf32>
    %cst_10 = arith.constant 3.200000e+01 : f32
    %13 = vector.broadcast %cst_10 : f32 to vector<8x1xf32>
    %14 = arith.divf %12, %13 : vector<8x1xf32>
    %cst_11 = arith.constant 9.99999974E-6 : f32
    %15 = vector.broadcast %cst_11 : f32 to vector<8x1xf32>
    %16 = arith.addf %14, %15 : vector<8x1xf32>
    %17 = math.rsqrt %16 : vector<8x1xf32>
    %18 = vector.broadcast %17 : vector<8x1xf32> to vector<8x32xf32>
    %19 = arith.mulf %1, %18 : vector<8x32xf32>
    %20 = vector.broadcast %9 : vector<1x32xf32> to vector<8x32xf32>
    %21 = arith.mulf %19, %20 : vector<8x32xf32>
    %c1_12 = arith.constant 1 : index
    %c0_13 = arith.constant 0 : index
    %c0_14 = arith.constant 0 : index
    %22 = vector.load %arg6[%c1_12, %c0_13, %c0_14] : memref<2x32x96xf32, #tpu.memory_space<vmem>>, vector<1x32x96xf32>
    %23 = vector.shape_cast %22 : vector<1x32x96xf32> to vector<32x96xf32>
    %cst_15 = arith.constant dense<0.000000e+00> : vector<8x96xf32>
    %24 = tpu.matmul %21, %23, %cst_15 {dimension_numbers = #tpu.dot_dimension_numbers<[1], [0], [0], [1], [0, 0, 1, 1], [], []>} : vector<8x32xf32>, vector<32x96xf32>, vector<8x96xf32> -> vector<8x96xf32>
    %25 = vector.extract_strided_slice %24 {offsets = [0, 0], sizes = [8, 32], strides = [1, 1]} : vector<8x96xf32> to vector<8x32xf32>
    %26 = vector.extract_strided_slice %24 {offsets = [0, 32], sizes = [8, 32], strides = [1, 1]} : vector<8x96xf32> to vector<8x32xf32>
    %27 = vector.extract_strided_slice %24 {offsets = [0, 64], sizes = [8, 32], strides = [1, 1]} : vector<8x96xf32> to vector<8x32xf32>
    %28 = vector.extract_strided_slice %25 {offsets = [0, 0], sizes = [8, 8], strides = [1, 1]} : vector<8x32xf32> to vector<8x8xf32>
    %29 = vector.extract_strided_slice %25 {offsets = [0, 8], sizes = [8, 8], strides = [1, 1]} : vector<8x32xf32> to vector<8x8xf32>
    %30 = vector.extract_strided_slice %25 {offsets = [0, 16], sizes = [8, 8], strides = [1, 1]} : vector<8x32xf32> to vector<8x8xf32>
    %31 = vector.extract_strided_slice %25 {offsets = [0, 24], sizes = [8, 8], strides = [1, 1]} : vector<8x32xf32> to vector<8x8xf32>
    %32 = vector.shape_cast %28 : vector<8x8xf32> to vector<1x8x8xf32>
    %33 = vector.shape_cast %29 : vector<8x8xf32> to vector<1x8x8xf32>
    %34 = vector.shape_cast %30 : vector<8x8xf32> to vector<1x8x8xf32>
    %35 = vector.shape_cast %31 : vector<8x8xf32> to vector<1x8x8xf32>
    %36 = tpu.concatenate %32, %33, %34, %35 in 0 : vector<1x8x8xf32>, vector<1x8x8xf32>, vector<1x8x8xf32>, vector<1x8x8xf32> -> vector<4x8x8xf32>
    %37 = vector.extract_strided_slice %26 {offsets = [0, 0], sizes = [8, 8], strides = [1, 1]} : vector<8x32xf32> to vector<8x8xf32>
    %38 = vector.extract_strided_slice %26 {offsets = [0, 8], sizes = [8, 8], strides = [1, 1]} : vector<8x32xf32> to vector<8x8xf32>
    %39 = vector.extract_strided_slice %26 {offsets = [0, 16], sizes = [8, 8], strides = [1, 1]} : vector<8x32xf32> to vector<8x8xf32>
    %40 = vector.extract_strided_slice %26 {offsets = [0, 24], sizes = [8, 8], strides = [1, 1]} : vector<8x32xf32> to vector<8x8xf32>
    %41 = vector.shape_cast %37 : vector<8x8xf32> to vector<1x8x8xf32>
    %42 = vector.shape_cast %38 : vector<8x8xf32> to vector<1x8x8xf32>
    %43 = vector.shape_cast %39 : vector<8x8xf32> to vector<1x8x8xf32>
    %44 = vector.shape_cast %40 : vector<8x8xf32> to vector<1x8x8xf32>
    %45 = tpu.concatenate %41, %42, %43, %44 in 0 : vector<1x8x8xf32>, vector<1x8x8xf32>, vector<1x8x8xf32>, vector<1x8x8xf32> -> vector<4x8x8xf32>
    %46 = vector.extract_strided_slice %27 {offsets = [0, 0], sizes = [8, 8], strides = [1, 1]} : vector<8x32xf32> to vector<8x8xf32>
    %47 = vector.extract_strided_slice %27 {offsets = [0, 8], sizes = [8, 8], strides = [1, 1]} : vector<8x32xf32> to vector<8x8xf32>
    %48 = vector.extract_strided_slice %27 {offsets = [0, 16], sizes = [8, 8], strides = [1, 1]} : vector<8x32xf32> to vector<8x8xf32>
    %49 = vector.extract_strided_slice %27 {offsets = [0, 24], sizes = [8, 8], strides = [1, 1]} : vector<8x32xf32> to vector<8x8xf32>
    %50 = vector.shape_cast %46 : vector<8x8xf32> to vector<1x8x8xf32>
    %51 = vector.shape_cast %47 : vector<8x8xf32> to vector<1x8x8xf32>
    %52 = vector.shape_cast %48 : vector<8x8xf32> to vector<1x8x8xf32>
    %53 = vector.shape_cast %49 : vector<8x8xf32> to vector<1x8x8xf32>
    %54 = tpu.concatenate %50, %51, %52, %53 in 0 : vector<1x8x8xf32>, vector<1x8x8xf32>, vector<1x8x8xf32>, vector<1x8x8xf32> -> vector<4x8x8xf32>
    %55 = vector.broadcast %3 : vector<1x8x8xf32> to vector<4x8x8xf32>
    %56 = arith.mulf %36, %55 : vector<4x8x8xf32>
    %57 = vector.extract_strided_slice %36 {offsets = [0, 0, 4], sizes = [4, 8, 4], strides = [1, 1, 1]} : vector<4x8x8xf32> to vector<4x8x4xf32>
    %58 = vector.extract_strided_slice %36 {offsets = [0, 0, 0], sizes = [4, 8, 4], strides = [1, 1, 1]} : vector<4x8x8xf32> to vector<4x8x4xf32>
    %59 = tpu.concatenate %57, %58 in 2 : vector<4x8x4xf32>, vector<4x8x4xf32> -> vector<4x8x8xf32>
    %60 = vector.broadcast %5 : vector<1x8x8xf32> to vector<4x8x8xf32>
    %61 = arith.mulf %59, %60 : vector<4x8x8xf32>
    %62 = arith.addf %56, %61 : vector<4x8x8xf32>
    %63 = vector.broadcast %3 : vector<1x8x8xf32> to vector<4x8x8xf32>
    %64 = arith.mulf %45, %63 : vector<4x8x8xf32>
    %65 = vector.extract_strided_slice %45 {offsets = [0, 0, 4], sizes = [4, 8, 4], strides = [1, 1, 1]} : vector<4x8x8xf32> to vector<4x8x4xf32>
    %66 = vector.extract_strided_slice %45 {offsets = [0, 0, 0], sizes = [4, 8, 4], strides = [1, 1, 1]} : vector<4x8x8xf32> to vector<4x8x4xf32>
    %67 = tpu.concatenate %65, %66 in 2 : vector<4x8x4xf32>, vector<4x8x4xf32> -> vector<4x8x8xf32>
    %68 = vector.broadcast %5 : vector<1x8x8xf32> to vector<4x8x8xf32>
    %69 = arith.mulf %67, %68 : vector<4x8x8xf32>
    %70 = arith.addf %64, %69 : vector<4x8x8xf32>
    "tpu.trace_start"() <{level = 10 : i32, message = "hld,hmd->hlm"}> : () -> ()
    %cst_16 = arith.constant dense<0.000000e+00> : vector<4x8x8xf32>
    %71 = tpu.matmul %62, %70, %cst_16 {dimension_numbers = #tpu.dot_dimension_numbers<[2], [2], [1], [1], [0, 0, 0, 1, 1, 1], [0], [0]>} : vector<4x8x8xf32>, vector<4x8x8xf32>, vector<4x8x8xf32> -> vector<4x8x8xf32>
    "tpu.trace_stop"() : () -> ()
    %cst_17 = arith.constant 0.353553385 : f32
    %72 = vector.broadcast %cst_17 : f32 to vector<4x8x8xf32>
    %73 = arith.mulf %71, %72 : vector<4x8x8xf32>
    %74 = vector.broadcast %7 : vector<1x8x8xf32> to vector<4x8x8xf32>
    %75 = arith.addf %73, %74 : vector<4x8x8xf32>
    %cst_18 = arith.constant dense<0xFF800000> : vector<4x8xf32>
    %76 = vector.multi_reduction <maximumf>, %75, %cst_18 [2] : vector<4x8x8xf32> to vector<4x8xf32>
    %77 = vector.shape_cast %76 : vector<4x8xf32> to vector<4x8x1xf32>
    %78 = vector.broadcast %77 : vector<4x8x1xf32> to vector<4x8x8xf32>
    %79 = arith.subf %75, %78 : vector<4x8x8xf32>
    %80 = math.exp %79 : vector<4x8x8xf32>
    %cst_19 = arith.constant dense<0.000000e+00> : vector<4x8xf32>
    %81 = vector.multi_reduction <add>, %80, %cst_19 [2] : vector<4x8x8xf32> to vector<4x8xf32>
    %82 = vector.shape_cast %81 : vector<4x8xf32> to vector<4x8x1xf32>
    %83 = tpu.reciprocal %82 {approx = true} : vector<4x8x1xf32> -> vector<4x8x1xf32>
    %84 = vector.broadcast %83 : vector<4x8x1xf32> to vector<4x8x8xf32>
    %85 = arith.mulf %80, %84 : vector<4x8x8xf32>
    "tpu.trace_start"() <{level = 10 : i32, message = "hlm,hmd->hld"}> : () -> ()
    %cst_20 = arith.constant dense<0.000000e+00> : vector<4x8x8xf32>
    %86 = tpu.matmul %85, %54, %cst_20 {dimension_numbers = #tpu.dot_dimension_numbers<[2], [1], [1], [2], [0, 0, 0, 1, 1, 2], [0], [0]>} : vector<4x8x8xf32>, vector<4x8x8xf32>, vector<4x8x8xf32> -> vector<4x8x8xf32>
    "tpu.trace_stop"() : () -> ()
    %87 = vector.extract_strided_slice %86 {offsets = [0, 0, 0], sizes = [1, 8, 8], strides = [1, 1, 1]} : vector<4x8x8xf32> to vector<1x8x8xf32>
    %88 = vector.shape_cast %87 : vector<1x8x8xf32> to vector<8x8xf32>
    %89 = vector.extract_strided_slice %86 {offsets = [1, 0, 0], sizes = [1, 8, 8], strides = [1, 1, 1]} : vector<4x8x8xf32> to vector<1x8x8xf32>
    %90 = vector.shape_cast %89 : vector<1x8x8xf32> to vector<8x8xf32>
    %91 = vector.extract_strided_slice %86 {offsets = [2, 0, 0], sizes = [1, 8, 8], strides = [1, 1, 1]} : vector<4x8x8xf32> to vector<1x8x8xf32>
    %92 = vector.shape_cast %91 : vector<1x8x8xf32> to vector<8x8xf32>
    %93 = vector.extract_strided_slice %86 {offsets = [3, 0, 0], sizes = [1, 8, 8], strides = [1, 1, 1]} : vector<4x8x8xf32> to vector<1x8x8xf32>
    %94 = vector.shape_cast %93 : vector<1x8x8xf32> to vector<8x8xf32>
    %95 = tpu.concatenate %88, %90, %92, %94 in 1 : vector<8x8xf32>, vector<8x8xf32>, vector<8x8xf32>, vector<8x8xf32> -> vector<8x32xf32>
    %c1_21 = arith.constant 1 : index
    %c0_22 = arith.constant 0 : index
    %c0_23 = arith.constant 0 : index
    %96 = vector.load %arg7[%c1_21, %c0_22, %c0_23] : memref<2x32x32xf32, #tpu.memory_space<vmem>>, vector<1x32x32xf32>
    %97 = vector.shape_cast %96 : vector<1x32x32xf32> to vector<32x32xf32>
    %cst_24 = arith.constant dense<0.000000e+00> : vector<8x32xf32>
    %98 = tpu.matmul %95, %97, %cst_24 {dimension_numbers = #tpu.dot_dimension_numbers<[1], [0], [0], [1], [0, 0, 1, 1], [], []>} : vector<8x32xf32>, vector<32x32xf32>, vector<8x32xf32> -> vector<8x32xf32>
    %99 = arith.addf %1, %98 : vector<8x32xf32>
    %c1_25 = arith.constant 1 : index
    %c0_26 = arith.constant 0 : index
    %c0_27 = arith.constant 0 : index
    %100 = vector.load %arg8[%c1_25, %c0_26, %c0_27] : memref<2x1x32xf32, #tpu.memory_space<vmem>>, vector<1x1x32xf32>
    %101 = vector.shape_cast %100 : vector<1x1x32xf32> to vector<1x32xf32>
    %102 = arith.mulf %99, %99 : vector<8x32xf32>
    %cst_28 = arith.constant dense<0.000000e+00> : vector<8xf32>
    %103 = vector.multi_reduction <add>, %102, %cst_28 [1] : vector<8x32xf32> to vector<8xf32>
    %104 = vector.shape_cast %103 : vector<8xf32> to vector<8x1xf32>
    %cst_29 = arith.constant 3.200000e+01 : f32
    %105 = vector.broadcast %cst_29 : f32 to vector<8x1xf32>
    %106 = arith.divf %104, %105 : vector<8x1xf32>
    %cst_30 = arith.constant 9.99999974E-6 : f32
    %107 = vector.broadcast %cst_30 : f32 to vector<8x1xf32>
    %108 = arith.addf %106, %107 : vector<8x1xf32>
    %109 = math.rsqrt %108 : vector<8x1xf32>
    %110 = vector.broadcast %109 : vector<8x1xf32> to vector<8x32xf32>
    %111 = arith.mulf %99, %110 : vector<8x32xf32>
    %112 = vector.broadcast %101 : vector<1x32xf32> to vector<8x32xf32>
    %113 = arith.mulf %111, %112 : vector<8x32xf32>
    %c1_31 = arith.constant 1 : index
    %c0_32 = arith.constant 0 : index
    %c0_33 = arith.constant 0 : index
    %114 = vector.load %arg9[%c1_31, %c0_32, %c0_33] : memref<2x32x256xf32, #tpu.memory_space<vmem>>, vector<1x32x256xf32>
    %115 = vector.shape_cast %114 : vector<1x32x256xf32> to vector<32x256xf32>
    %cst_34 = arith.constant dense<0.000000e+00> : vector<8x256xf32>
    %116 = tpu.matmul %113, %115, %cst_34 {dimension_numbers = #tpu.dot_dimension_numbers<[1], [0], [0], [1], [0, 0, 1, 1], [], []>} : vector<8x32xf32>, vector<32x256xf32>, vector<8x256xf32> -> vector<8x256xf32>
    %117 = vector.extract_strided_slice %116 {offsets = [0, 0], sizes = [8, 128], strides = [1, 1]} : vector<8x256xf32> to vector<8x128xf32>
    %118 = vector.extract_strided_slice %116 {offsets = [0, 128], sizes = [8, 128], strides = [1, 1]} : vector<8x256xf32> to vector<8x128xf32>
    %cst_35 = arith.constant 0.000000e+00 : f32
    %119 = vector.broadcast %cst_35 : f32 to vector<8x128xf32>
    %120 = arith.subf %119, %117 : vector<8x128xf32>
    %121 = math.exp %120 : vector<8x128xf32>
    %cst_36 = arith.constant 1.000000e+00 : f32
    %122 = vector.broadcast %cst_36 : f32 to vector<8x128xf32>
    %123 = arith.addf %122, %121 : vector<8x128xf32>
    %124 = tpu.reciprocal %123 {approx = true} : vector<8x128xf32> -> vector<8x128xf32>
    %125 = arith.mulf %117, %124 : vector<8x128xf32>
    %126 = arith.mulf %125, %118 : vector<8x128xf32>
    %c1_37 = arith.constant 1 : index
    %c0_38 = arith.constant 0 : index
    %c0_39 = arith.constant 0 : index
    %127 = vector.load %arg10[%c1_37, %c0_38, %c0_39] : memref<2x128x32xf32, #tpu.memory_space<vmem>>, vector<1x128x32xf32>
    %128 = vector.shape_cast %127 : vector<1x128x32xf32> to vector<128x32xf32>
    %cst_40 = arith.constant dense<0.000000e+00> : vector<8x32xf32>
    %129 = tpu.matmul %126, %128, %cst_40 {dimension_numbers = #tpu.dot_dimension_numbers<[1], [0], [0], [1], [0, 0, 1, 1], [], []>} : vector<8x128xf32>, vector<128x32xf32>, vector<8x32xf32> -> vector<8x32xf32>
    %130 = arith.addf %99, %129 : vector<8x32xf32>
    %c0_41 = arith.constant 0 : index
    %c0_42 = arith.constant 0 : index
    %131 = vector.load %arg11[%c0_41, %c0_42] : memref<1x32xf32, #tpu.memory_space<vmem>>, vector<1x32xf32>
    %132 = arith.mulf %130, %130 : vector<8x32xf32>
    %cst_43 = arith.constant dense<0.000000e+00> : vector<8xf32>
    %133 = vector.multi_reduction <add>, %132, %cst_43 [1] : vector<8x32xf32> to vector<8xf32>
    %134 = vector.shape_cast %133 : vector<8xf32> to vector<8x1xf32>
    %cst_44 = arith.constant 3.200000e+01 : f32
    %135 = vector.broadcast %cst_44 : f32 to vector<8x1xf32>
    %136 = arith.divf %134, %135 : vector<8x1xf32>
    %cst_45 = arith.constant 9.99999974E-6 : f32
    %137 = vector.broadcast %cst_45 : f32 to vector<8x1xf32>
    %138 = arith.addf %136, %137 : vector<8x1xf32>
    %139 = math.rsqrt %138 : vector<8x1xf32>
    %140 = vector.broadcast %139 : vector<8x1xf32> to vector<8x32xf32>
    %141 = arith.mulf %130, %140 : vector<8x32xf32>
    %142 = vector.broadcast %131 : vector<1x32xf32> to vector<8x32xf32>
    %143 = arith.mulf %141, %142 : vector<8x32xf32>
    %c0_46 = arith.constant 0 : index
    %c0_47 = arith.constant 0 : index
    %144 = vector.load %arg12[%c0_46, %c0_47] : memref<32x128xf32, #tpu.memory_space<vmem>>, vector<32x128xf32>
    %cst_48 = arith.constant dense<0.000000e+00> : vector<8x128xf32>
    %145 = tpu.matmul %143, %144, %cst_48 {dimension_numbers = #tpu.dot_dimension_numbers<[1], [0], [0], [1], [0, 0, 1, 1], [], []>} : vector<8x32xf32>, vector<32x128xf32>, vector<8x128xf32> -> vector<8x128xf32>
    %c0_49 = arith.constant 0 : index
    %c0_50 = arith.constant 0 : index
    %c0_51 = arith.constant 0 : index
    %146 = vector.load %arg13[%c0_49, %c0_50, %c0_51] : memref<1x8x128xf32, #tpu.memory_space<vmem>>, vector<1x8x128xf32>
    %147 = vector.shape_cast %146 : vector<1x8x128xf32> to vector<8x128xf32>
    %148 = vector.shape_cast %145 : vector<8x128xf32> to vector<1x8x128xf32>
    tpu.vector_store %arg13[%c0_49, %c0_50, %c0_51], %148 {strides = array<i32>} : memref<1x8x128xf32, #tpu.memory_space<vmem>>, vector<1x8x128xf32>,
    return
  }
  func.func @transform_0(%arg0: i32) -> (i32, i32, i32) {
    %c0_i32 = arith.constant 0 : i32
    %c0_i32_0 = arith.constant 0 : i32
    %c0_i32_1 = arith.constant 0 : i32
    return %arg0, %c0_i32, %c0_i32_0 : i32, i32, i32
  }
  func.func @transform_1(%arg0: i32) -> (i32, i32) {
    %c0_i32 = arith.constant 0 : i32
    %c0_i32_0 = arith.constant 0 : i32
    %c0_i32_1 = arith.constant 0 : i32
    return %c0_i32, %c0_i32_0 : i32, i32
  }
  func.func @transform_2(%arg0: i32) -> (i32, i32) {
    %c0_i32 = arith.constant 0 : i32
    %c0_i32_0 = arith.constant 0 : i32
    %c0_i32_1 = arith.constant 0 : i32
    return %c0_i32, %c0_i32_0 : i32, i32
  }
  func.func @transform_3(%arg0: i32) -> (i32, i32) {
    %c0_i32 = arith.constant 0 : i32
    %c0_i32_0 = arith.constant 0 : i32
    %c0_i32_1 = arith.constant 0 : i32
    return %c0_i32, %c0_i32_0 : i32, i32
  }
  func.func @transform_4(%arg0: i32) -> (i32, i32, i32) {
    %c0_i32 = arith.constant 0 : i32
    %c0_i32_0 = arith.constant 0 : i32
    %c0_i32_1 = arith.constant 0 : i32
    %c0_i32_2 = arith.constant 0 : i32
    return %c0_i32, %c0_i32_0, %c0_i32_1 : i32, i32, i32
  }
  func.func @transform_5(%arg0: i32) -> (i32, i32, i32) {
    %c0_i32 = arith.constant 0 : i32
    %c0_i32_0 = arith.constant 0 : i32
    %c0_i32_1 = arith.constant 0 : i32
    %c0_i32_2 = arith.constant 0 : i32
    return %c0_i32, %c0_i32_0, %c0_i32_1 : i32, i32, i32
  }
  func.func @transform_6(%arg0: i32) -> (i32, i32, i32) {
    %c0_i32 = arith.constant 0 : i32
    %c0_i32_0 = arith.constant 0 : i32
    %c0_i32_1 = arith.constant 0 : i32
    %c0_i32_2 = arith.constant 0 : i32
    return %c0_i32, %c0_i32_0, %c0_i32_1 : i32, i32, i32
  }
  func.func @transform_7(%arg0: i32) -> (i32, i32, i32) {
    %c0_i32 = arith.constant 0 : i32
    %c0_i32_0 = arith.constant 0 : i32
    %c0_i32_1 = arith.constant 0 : i32
    %c0_i32_2 = arith.constant 0 : i32
    return %c0_i32, %c0_i32_0, %c0_i32_1 : i32, i32, i32
  }
  func.func @transform_8(%arg0: i32) -> (i32, i32, i32) {
    %c0_i32 = arith.constant 0 : i32
    %c0_i32_0 = arith.constant 0 : i32
    %c0_i32_1 = arith.constant 0 : i32
    %c0_i32_2 = arith.constant 0 : i32
    return %c0_i32, %c0_i32_0, %c0_i32_1 : i32, i32, i32
  }
  func.func @transform_9(%arg0: i32) -> (i32, i32, i32) {
    %c0_i32 = arith.constant 0 : i32
    %c0_i32_0 = arith.constant 0 : i32
    %c0_i32_1 = arith.constant 0 : i32
    %c0_i32_2 = arith.constant 0 : i32
    return %c0_i32, %c0_i32_0, %c0_i32_1 : i32, i32, i32
  }
  func.func @transform_10(%arg0: i32) -> (i32, i32) {
    %c0_i32 = arith.constant 0 : i32
    %c0_i32_0 = arith.constant 0 : i32
    %c0_i32_1 = arith.constant 0 : i32
    return %c0_i32, %c0_i32_0 : i32, i32
  }
  func.func @transform_11(%arg0: i32) -> (i32, i32) {
    %c0_i32 = arith.constant 0 : i32
    %c0_i32_0 = arith.constant 0 : i32
    %c0_i32_1 = arith.constant 0 : i32
    return %c0_i32, %c0_i32_0 : i32, i32
  }
  func.func @transform_12(%arg0: i32) -> (i32, i32, i32) {
    %c0_i32 = arith.constant 0 : i32
    %c0_i32_0 = arith.constant 0 : i32
    %c0_i32_1 = arith.constant 0 : i32
    return %arg0, %c0_i32, %c0_i32_0 : i32, i32, i32
  }
}

</mosaic_0001>

<bundles_post_ra>
// kernel: neg.1
= control target key start
LH: loop header
LB: loop body
LE: loop exit
PB: predicated region body
PF: predicated region fallthrough
CT: control target
= control target key end

     0   :  { %s24_s0 = inlined_call_operand.vmem [shape: f32[8,4], index: 0, kind: input, shape index: {}]   ;;  %s25_s1 = inlined_call_operand.vmem [shape: f32[8,4], index: 1, kind: output, shape index: {}]  }
   0x1   :  { %v2_v0 = vld [vmem:[%s24_s0] sm:$0xff] }
   0x2   :  { %v5_v1 = vxor.u32 2147483648, %v2_v0 }
   0x4   :  { %7 = vst [vmem:[%s25_s1] sm:$0xff] %v5_v1 }

// kernel: kanama_forward.1
= control target key start
LH: loop header
LB: loop body
LE: loop exit
PB: predicated region body
PF: predicated region fallthrough
CT: control target
= control target key end

     0   :  { %s2625_s0 = inlined_call_operand.vmem [shape: f32[2,8,32], index: 0, kind: input, shape index: {}]   ;;  %s2626_s1 = inlined_call_operand.vmem [shape: f32[8,8], index: 1, kind: input, shape index: {}]   ;;  %s2627_s2 = inlined_call_operand.vmem [shape: f32[8,8], index: 2, kind: input, shape index: {}]   ;;  %s2628_s3 = inlined_call_operand.vmem [shape: f32[8,8], index: 3, kind: input, shape index: {}]   ;;  %s2629_s4 = inlined_call_operand.vmem [shape: f32[2,1,32], index: 4, kind: input, shape index: {}]   ;;  %s2630_s5 = inlined_call_operand.vmem [shape: f32[2,32,96], index: 5, kind: input, shape index: {}]   ;;  %s2631_s6 = inlined_call_operand.vmem [shape: f32[2,32,32], index: 6, kind: input, shape index: {}]   ;;  %s2632_s7 = inlined_call_operand.vmem [shape: f32[2,1,32], index: 7, kind: input, shape index: {}]   ;;  %s2633_s8 = inlined_call_operand.vmem [shape: f32[2,32,256], index: 8, kind: input, shape index: {}]   ;;  %s2634_s9 = inlined_call_operand.vmem [shape: f32[2,128,32], index: 9, kind: input, shape index: {}]   ;;  %s2635_s10 = inlined_call_operand.vmem [shape: f32[1,32], index: 10, kind: input, shape index: {}]   ;;  %s2636_s11 = inlined_call_operand.vmem [shape: f32[32,128], index: 11, kind: input, shape index: {}]   ;;  %s2637_s12 = inlined_call_operand.hbm [shape: f32[2,8,128], index: 12, kind: output, shape index: {}]  }
   0x1   :  { %2638 = sst [smem:[#allocation5_spill]] %s2625_s0 }
   0x2   :  { %2639 = sst [smem:[#allocation6_spill]] %s2626_s1 }
   0x3   :  { %17 = vsyncpa [#allocation3], 0 }
   0x4   :  { %19 = vsyncpa [#allocation3 + $0x1], 0  ;;  %s2244_s21 = smov 0   ;;  %s2246_s22 = smov 0  }
   0x5   :  { %s2248_s23 = smov 0   ;;  %s2250_s24 = smov 0  }
   0x6 LB: > { %s2265_s25 = sadd.s32 4294967295, %s2160_s24   ;;  %s1748_s26 = sadd.s32 4294967294, %s2160_s24   ;;  %s2160_s24 = sphi %s2250_s24, %s2647_s24   ;;  %s2156_s23 = sphi %s2248_s23, %s2646_s23   ;;  %s2152_s22 = sphi %s2246_s22, %s2645_s22   ;;  %s2148_s21 = sphi %s2244_s21, %s2644_s21  }
   0x7   : > { %s2269_s27 = sadd.s32 1, %s2160_s24   ;;  %s289_s28 = sadd.s32 1, %s2156_s23 }
   0x8   : > { %s286_s29 = ssub.s32 %s2160_s24, %s2269_s27  ;;  %p299_p0 = scmp.ne.s32.totalorder %s2156_s23, %s2152_s22 }
   0x9   : > { %p287_p1 = scmp.eq.s32.totalorder %s286_s29, 0  ;;  %p300_p2 = scmp.eq.s32.totalorder %s2265_s25, 1 }
   0xa   : > { %p305_p3 = scmp.ne.s32.totalorder %s2152_s22, %s2148_s21  ;;  %p306_p4 = scmp.eq.s32.totalorder %s1748_s26, 1 }
   0xb   : > { %s2280_s30 = scalar_select %p287_p1, %s2156_s23, %s289_s28  }
   0xc   : > { %p2282_p5 = por %p300_p2, %p299_p0  ;;  %p2286_p6 = por %p306_p4, %p305_p3 }
   0xd   : > { %p1751_p7 = scmp.ge.s32.totalorder %s2160_s24, 1  ;;  %p364_p8 = scmp.lt.s32.totalorder %s2160_s24, 3 }
   0xf   : > { %p365_p9 = pnand %p1751_p7, %p364_p8 }
  0x10   : > { %p405_p10 = scmp.lt.s32.totalorder (!%p365_p9), %s2265_s25, 1  ;;  %s2642_s0 = sld [smem:[#allocation5_spill]] (!%p365_p9)  ;;  %vm416_vm0 = vcmask (!%p365_p9), 261120   ;;  %v1756_v3 = vld [vmem:[%s2630_s5 + $0x20] sm:$0xff] (!%p365_p9)  ;;  %v1757_v4 = vld [vmem:[%s2630_s5 + $0x28] sm:$0xff] (!%p365_p9)  ;;  %v1758_v5 = vld [vmem:[%s2630_s5 + $0x30] sm:$0xff] (!%p365_p9) }
  0x11   : > { %368 = sbr.rel (%p365_p9) target bundleno = 2971 (0xb9b), region = 68  ;;  %v2162_v6 = vmov (!%p365_p9), 0.0|0.0   ;;  %v1968_v7 = vpack.c.bf16 (!%p365_p9), %v1757_v4, %v1756_v3  ;;  %v1759_v8 = vld [vmem:[%s2630_s5 + $0x38] sm:$0xff] (!%p365_p9)  ;;  %vm2163_vm1 = vmmov (!%p365_p9), 0   ;;  %v2164_v9 = vmov (!%p365_p9), 0.0   ;;  %s2165_s26 = smov (!%p365_p9), 112  }
  0x12   : > { %1967 = vmatprep.subr.bf16.mxu1 (!%p365_p9), %v2162_v6  ;;  %1867 = vmatprep.mubr.msk.f32.mxu1 (!%p365_p9), %vm2163_vm1, %v2164_v9  ;;  %v1971_v10 = vpack.c.bf16 (!%p365_p9), %v1759_v8, %v1758_v5  ;;  %v1755_v15 = vld [vmem:[%s2629_s4 + $0x1] ss:$0 sm:$0xff] (!%p365_p9)  ;;  %s2166_s28 = smov (!%p365_p9), 120   ;;  %s2167_s29 = smov (!%p365_p9), 104   ;;  %vm548_vm2 = vcmask (!%p365_p9), 31744   ;;  %vm624_vm3 = vcmask (!%p365_p9), 64512  }
  0x13   : > { %1890 = vmatprep.subr.mxu0 (!%p365_p9), %v2164_v9  ;;  %1892 = vmatprep.mubr.msk.f32.mxu0 (!%p365_p9), %vm2163_vm1, %v2164_v9  ;;  %s2169_s17 = smov (!%p365_p9), 100   ;;  %v2350_v24 = vld [vmem:[%s2627_s2] sm:$0xff] (!%p365_p9)  ;;  %s2643_s1 = sld [smem:[#allocation6_spill]] (!%p365_p9)  ;;  %vm1303_vm4 = vcmask (!%p365_p9), 130048   ;;  %vm1305_vm5 = vcmask (!%p365_p9), 195584  }
  0x14   : > { %1969 = vmatpush3.bf16.msra.mxu1 (!%p365_p9), %v1968_v7  ;;  %s2174_s18 = smov (!%p365_p9), 64   ;;  %s2177_s20 = smov (!%p365_p9), 24  }
  0x15   : > { %1970 = vmatprep.subr.bf16.mxu1 (!%p365_p9), %v2162_v6 }
  0x18   : > { %s406_s15 = scalar_select %p405_p10, %s2265_s25, 1  ;;  %1972 = vmatpush3.bf16.msra.mxu1 %v1971_v10 }
  0x19   : > { %1870 = vmatprep.subr.mxu1 %v2164_v9  ;;  %v2358_v28 = vld [vmem:[%s2643_s1] sm:$0xff] }
  0x1a   : > { %s1753_s16 = sshll.u32 %s406_s15, 3  ;;  %s2168_s15 = smov 92  }
  0x1b   : > { %s408_s19 = scalar_lea.vmem %s2642_s0, %s1753_s16 }
  0x1c   : > { %v2297_v0 = vld [vmem:[%s408_s19] sm:$0xff]  ;;  %s2170_s19 = smov 32  }
  0x1d   : > { %v415_v1 = vmul.f32 %v2297_v0, %v2297_v0 }
  0x1f   : > { %v417_v2 = vsel %vm416_vm0, %v415_v1, 0.0 }
  0x20   : > { %418 = vadd.xlane.f32.xlu0 %v417_v2 }
  0xad   : > { %v419_v11 = vpop.xlane.xlu0 %418 }
  0xae   : > { %v421_v12 = vmul.f32 0.03125, %v419_v11 }
  0xb0   : > { %v422_v13 = vadd.f32 1e-05, %v421_v12 }
  0xb2   : > { %2072 = vrsqrt.f32 %v422_v13 }
  0xbc   : > { %v2073_v14 = vpop.eup %2072 }
  0xbd   : > { %v424_v16 = vmul.f32 %v2073_v14, %v2297_v0 }
  0xbf   : > { %v431_v17 = vmul.f32 %v1755_v15, %v424_v16 }
  0xc1   : > { %1868 = vmatmul.mubr.msk.f32.vlgmr.msra.gmra.mrb[0].mxu1 %vm416_vm0, %v431_v17 }
  0xc2   : > { %1872 = vmatprep.mubr.msk.f32.mxu1 %vm2163_vm1, %v2164_v9 }
 0x194   : > { %v2329_v18 = vpop.f32.mrb[0].mxu1 }
 0x195   : > { %514 = vrot.lane.b32.xlu1 %v2329_v18, %s2165_s26  ;;  %511 = vrot.lane.b32.xlu0 %v2329_v18, %s2166_s28  ;;  %v1869_v19 = vpop.f32.mrb[1].mxu1  ;;  %s2171_s28 = smov 124   ;;  %v520_v59 = vmul.f32 %v2329_v18, %v2358_v28  ;;  %s402_s26 = sand.u32 1, %s2152_s22  }
 0x199   : > { %517 = vrot.lane.b32.xlu1 %v2329_v18, %s2167_s29  ;;  %s2172_s29 = smov 4  }
 0x19d   : > { %569 = vrot.lane.b32.xlu1 %v2329_v18, %s2168_s15 }
 0x1a1   : > { %581 = vrot.lane.b32.xlu1 %v2329_v18, %s2169_s17 }
 0x207   : > { %v2336_v20 = vpop.permute.xlu1 %514  ;;  %v2338_v21 = vpop.permute.xlu0 %511 }
 0x208   : > { %585 = vrot.lane.b32.xlu0 %v2336_v20, %s2169_s17  ;;  %571 = vrot.lane.b32.xlu1 %v2338_v21, %s2168_s15  ;;  %v521_v5 = vmul.f32 %v2338_v21, %v2358_v28  ;;  %v522_v11 = vmul.f32 %v2336_v20, %v2358_v28 }
 0x20b   : > { %v2342_v22 = vpop.permute.xlu1 %517 }
 0x20c   : > { %587 = vrot.lane.b32.xlu0 %v2342_v22, %s2169_s17  ;;  %583 = vrot.lane.b32.xlu1 %v2338_v21, %s2169_s17  ;;  %v523_v19 = vmul.f32 %v2342_v22, %v2358_v28  ;;  %s1808_s17 = sshll.u32 %s2265_s25, 7  ;;  %s2178_s25 = smov [#allocation2]  }
 0x20f   : > { %v570_v23 = vpop.permute.xlu1 %569 }
 0x210   : > { %573 = vrot.lane.b32.xlu1 %v2336_v20, %s2168_s15 }
 0x213   : > { %v582_v25 = vpop.permute.xlu1 %581 }
 0x214   : > { %v593_v26 = vsel %vm548_vm2, %v570_v23, %v582_v25  ;;  %575 = vrot.lane.b32.xlu1 %v2342_v22, %s2168_s15  ;;  %s2173_s15 = smov 96  }
 0x215   : > { %v597_v27 = vmul.f32 %v593_v26, %v2350_v24 }
 0x217   : > { %605 = vrot.lane.b32.xlu0 %v597_v27, %s2170_s19  ;;  %v412_v27 = vld [vmem:[%s2628_s3] sm:$0xff] }
 0x218   : > { %562 = vrot.lane.b32.xlu1 %v2358_v28, %s2170_s19 }
 0x27a   : > { %v572_v29 = vpop.permute.xlu1 %571  ;;  %v586_v32 = vpop.permute.xlu0 %585 }
 0x27e   : > { %v584_v30 = vpop.permute.xlu1 %583  ;;  %v588_v37 = vpop.permute.xlu0 %587 }
 0x27f   : > { %v594_v31 = vsel %vm548_vm2, %v572_v29, %v584_v30 }
 0x280   : > { %v598_v33 = vmul.f32 %v594_v31, %v2350_v24 }
 0x282   : > { %607 = vrot.lane.b32.xlu1 %v598_v33, %s2170_s19  ;;  %v574_v34 = vpop.permute.xlu1 %573 }
 0x283   : > { %v595_v35 = vsel %vm548_vm2, %v574_v34, %v586_v32 }
 0x284   : > { %v599_v36 = vmul.f32 %v595_v35, %v2350_v24 }
 0x286   : > { %609 = vrot.lane.b32.xlu0 %v599_v36, %s2170_s19  ;;  %v576_v38 = vpop.permute.xlu1 %575 }
 0x287   : > { %v596_v39 = vsel %vm548_vm2, %v576_v38, %v588_v37 }
 0x288   : > { %v600_v40 = vmul.f32 %v596_v39, %v2350_v24 }
 0x289   : > { %v606_v43 = vpop.permute.xlu0 %605 }
 0x28a   : > { %524 = vrot.lane.b32.xlu0 %v2329_v18, %s2171_s28  ;;  %611 = vrot.lane.b32.xlu1 %v600_v40, %s2170_s19  ;;  %v563_v41 = vpop.permute.xlu1 %562  ;;  %s2176_s19 = smov 16  }
 0x28b   : > { %v565_v42 = vmul.f32 %v563_v41, %v2329_v18  ;;  %v566_v45 = vmul.f32 %v563_v41, %v2338_v21  ;;  %v567_v48 = vmul.f32 %v563_v41, %v2336_v20  ;;  %v568_v51 = vmul.f32 %v563_v41, %v2342_v22 }
 0x28d   : > { %v617_v44 = vadd.f32 %v606_v43, %v565_v42 }
 0x28e   : > { %538 = vrot.lane.b32.xlu0 %v2338_v21, %s2172_s29  ;;  %536 = vrot.lane.b32.xlu1 %v2329_v18, %s2172_s29 }
 0x292   : > { %526 = vrot.lane.b32.xlu1 %v2338_v21, %s2171_s28  ;;  %622 = vrot.lane.b32.xlu0 %v617_v44, %s2173_s15 }
 0x296   : > { %540 = vrot.lane.b32.xlu1 %v2336_v20, %s2172_s29  ;;  %528 = vrot.lane.b32.xlu0 %v2336_v20, %s2171_s28 }
 0x2f4   : > { %v608_v46 = vpop.permute.xlu1 %607 }
 0x2f5   : > { %v618_v47 = vadd.f32 %v608_v46, %v566_v45 }
 0x2f7   : > { %701 = vrot.lane.b32.xlu1 %v618_v47, %s2173_s15 }
 0x2f8   : > { %v610_v49 = vpop.permute.xlu0 %609 }
 0x2f9   : > { %v619_v50 = vadd.f32 %v610_v49, %v567_v48 }
 0x2fb   : > { %779 = vrot.lane.b32.xlu0 %v619_v50, %s2173_s15  ;;  %530 = vrot.lane.b32.xlu1 %v2342_v22, %s2171_s28  ;;  %s1752_s28 = sshll.u32 %s402_s26, 3 }
 0x2fc   : > { %v525_v52 = vpop.permute.xlu0 %524  ;;  %v612_v53 = vpop.permute.xlu1 %611 }
 0x2fd   : > { %v620_v54 = vadd.f32 %v612_v53, %v568_v51 }
 0x2ff   : > { %542 = vrot.lane.b32.xlu0 %v2342_v22, %s2172_s29  ;;  %857 = vrot.lane.b32.xlu1 %v620_v54, %s2173_s15  ;;  %s404_s29 = scalar_lea.vmem [#allocation2], %s1752_s28  ;;  %s2102_s28 = sshll.u32 %s2178_s25, 4  ;;  %s2103_s28 = int_to_ptr.vmem [resolvable:$false] %s2102_s28 }
 0x300   : > { %v539_v55 = vpop.permute.xlu0 %538  ;;  %v537_v56 = vpop.permute.xlu1 %536  ;;  %s1689_s15 = sshll.u32 %s404_s29, 4  ;;  %s2104_s1 = scalar_lea.vmem %s2103_s28, 256  ;;  %s2580_s15 = int_to_ptr.vmem [resolvable:$true] %s1689_s15 }
 0x301   : > { %v549_v57 = vsel %vm548_vm2, %v525_v52, %v537_v56  ;;  %p2105_p0 = scmp.lt.s32.totalorder %s2580_s15, %s2103_s28 }
 0x302   : > { %v553_v58 = vmul.f32 %v549_v57, %v2350_v24 }
 0x304   : > { %v623_v60 = vpop.permute.xlu0 %622  ;;  %v557_v61 = vadd.f32 %v553_v58, %v520_v59  ;;  %v527_v62 = vpop.permute.xlu1 %526 }
 0x305   : > { %1871 = vmatpush3.xpose.msk.msra.mxu1 %vm624_vm3, %v623_v60  ;;  %v550_v63 = vsel %vm548_vm2, %v527_v62, %v539_v55 }
 0x306   : > { %1875 = vmatprep.subr.mxu1 %v2164_v9  ;;  %v554_v3 = vmul.f32 %v550_v63, %v2350_v24 }
 0x308   : > { %1873 = vmatmul.mubr.msk.f32.vlgmr.msra.gmra.mrb[2].mxu1 %vm624_vm3, %v557_v61  ;;  %v529_v1 = vpop.permute.xlu0 %528  ;;  %v541_v2 = vpop.permute.xlu1 %540  ;;  %v558_v8 = vadd.f32 %v554_v3, %v521_v5 }
 0x309   : > { %1877 = vmatprep.mubr.msk.f32.mxu1 %vm2163_vm1, %v2164_v9  ;;  %v551_v4 = vsel %vm548_vm2, %v529_v1, %v541_v2 }
 0x30a   : > { %v555_v10 = vmul.f32 %v551_v4, %v2350_v24 }
 0x30c   : > { %v559_v14 = vadd.f32 %v555_v10, %v522_v11 }
 0x369   : > { %v702_v7 = vpop.permute.xlu1 %701 }
 0x36a   : > { %1876 = vmatpush3.xpose.msk.msra.mxu1 %vm624_vm3, %v702_v7 }
 0x36b   : > { %1880 = vmatprep.subr.mxu1 %v2164_v9 }
 0x36d   : > { %v780_v12 = vpop.permute.xlu0 %779  ;;  %v531_v13 = vpop.permute.xlu1 %530  ;;  %1878 = vmatmul.mubr.msk.f32.vlgmr.msra.gmra.mrb[4].mxu1 %vm624_vm3, %v558_v8 }
 0x36e   : > { %1881 = vmatpush3.xpose.msk.msra.mxu1 %vm624_vm3, %v780_v12  ;;  %1882 = vmatprep.mubr.msk.f32.mxu1 %vm2163_vm1, %v2164_v9 }
 0x36f   : > { %1885 = vmatprep.subr.mxu1 %v2164_v9 }
 0x371   : > { %v543_v15 = vpop.permute.xlu0 %542  ;;  %v858_v16 = vpop.permute.xlu1 %857  ;;  %1883 = vmatmul.mubr.msk.f32.vlgmr.msra.gmra.mrb[6].mxu1 %vm624_vm3, %v559_v14 }
 0x372   : > { %v552_v17 = vsel %vm548_vm2, %v531_v13, %v543_v15  ;;  %1886 = vmatpush3.xpose.msk.msra.mxu1 %vm624_vm3, %v858_v16  ;;  %1887 = vmatprep.mubr.msk.f32.mxu1 %vm2163_vm1, %v2164_v9 }
 0x373   : > { %v556_v23 = vmul.f32 %v552_v17, %v2350_v24  ;;  %1895 = vmatprep.subr.mxu1 %v2164_v9 }
 0x375   : > { %v560_v25 = vadd.f32 %v556_v23, %v523_v19  ;;  %v1773_v23 = vld [vmem:[%s2631_s6 + $0x20] sm:$0xff] }
 0x377   : > { %1888 = vmatmul.mubr.msk.f32.vlgmr.msra.gmra.mrb[8].mxu1 %vm624_vm3, %v560_v25  ;;  %v1774_v25 = vld [vmem:[%s2631_s6 + $0x28] sm:$0xff] }
 0x378   : > { %1897 = vmatprep.mubr.msk.f32.mxu1 %vm2163_vm1, %v2164_v9 }
 0x3db   : > { %v696_v26 = vpop.f32.mrb[2].mxu1 }
 0x3dc   : > { %v934_v29 = vmul.f32 0.35355338, %v696_v26  ;;  %v1874_v30 = vpop.f32.mrb[3].mxu1  ;;  %v1974_v26 = vpack.c.bf16 %v1774_v25, %v1773_v23  ;;  %v1803_v23 = vld [vmem:[%s2634_s9 + $0xf0] sm:$0xff]  ;;  %v1804_v25 = vld [vmem:[%s2634_s9 + $0xf8] sm:$0xff] }
 0x3de   : > { %v938_v31 = vadd.f32 %v934_v29, %v412_v27  ;;  %v1776_v29 = vld [vmem:[%s2631_s6 + $0x38] sm:$0xff] }
 0x3e0   : > { %v942_v28 = vsel %vm624_vm3, %v938_v31, -inf }
 0x3e1   : > { %943 = vmax.xlane.f32.xlu0 %v942_v28 }
 0x440   : > { %v774_v24 = vpop.f32.mrb[4].mxu1 }
 0x441   : > { %v935_v32 = vmul.f32 0.35355338, %v774_v24  ;;  %v1879_v33 = vpop.f32.mrb[5].mxu1 }
 0x443   : > { %v939_v34 = vadd.f32 %v935_v32, %v412_v27 }
 0x444   : > { %v852_v35 = vpop.f32.mrb[6].mxu1 }
 0x445   : > { %v936_v36 = vmul.f32 0.35355338, %v852_v35  ;;  %v1884_v37 = vpop.f32.mrb[7].mxu1  ;;  %v945_v38 = vsel %vm624_vm3, %v939_v34, -inf }
 0x446   : > { %946 = vmax.xlane.f32.xlu1 %v945_v38 }
 0x447   : > { %v940_v39 = vadd.f32 %v936_v36, %v412_v27 }
 0x449   : > { %v948_v40 = vsel %vm624_vm3, %v940_v39, -inf }
 0x44a   : > { %949 = vmax.xlane.f32.xlu0 %v948_v40  ;;  %v930_v41 = vpop.f32.mrb[8].mxu1 }
 0x44b   : > { %v937_v42 = vmul.f32 0.35355338, %v930_v41  ;;  %v1889_v43 = vpop.f32.mrb[9].mxu1 }
 0x44d   : > { %v941_v44 = vadd.f32 %v937_v42, %v412_v27  ;;  %v1775_v27 = vld [vmem:[%s2631_s6 + $0x30] sm:$0xff] }
 0x44e   : > { %v1977_v30 = vpack.c.bf16 %v1776_v29, %v1775_v27 }
 0x44f   : > { %v951_v45 = vsel %vm624_vm3, %v941_v44, -inf }
 0x450   : > { %952 = vmax.xlane.f32.xlu0 %v951_v45 }
 0x457   : > { %986 = vrot.lane.b32.xlu1 %v2329_v18, %s2174_s18 }
 0x46e   : > { %v944_v46 = vpop.xlane.xlu0 %943 }
 0x46f   : > { %v954_v47 = vsub.f32 %v938_v31, %v944_v46  ;;  %v1781_v46 = vld [vmem:[%s2633_s8 + $0x48] sm:$0xff] }
 0x471   : > { %v958_v48 = vmul.f32 1.442695, %v954_v47  ;;  %v1783_v47 = vld [vmem:[%s2633_s8 + $0x58] sm:$0xff] }
 0x473   : > { %2074 = vpow2.f32 %v958_v48  ;;  %v1979_v48 = vpack.c.bf16 %v1783_v47, %v1781_v46 }
 0x47d   : > { %v2075_v49 = vpop.eup %2074 }
 0x47e   : > { %v966_v50 = vsel %vm624_vm3, %v2075_v49, 0.0 }
 0x47f   : > { %967 = vadd.xlane.f32.xlu1 %v966_v50 }
 0x4d3   : > { %v947_v51 = vpop.xlane.xlu1 %946 }
 0x4d4   : > { %v955_v52 = vsub.f32 %v939_v34, %v947_v51  ;;  %v1785_v51 = vld [vmem:[%s2633_s8 + $0x68] sm:$0xff] }
 0x4d6   : > { %v960_v53 = vmul.f32 1.442695, %v955_v52  ;;  %v1787_v52 = vld [vmem:[%s2633_s8 + $0x78] sm:$0xff] }
 0x4d7   : > { %v987_v54 = vpop.permute.xlu1 %986  ;;  %v950_v55 = vpop.xlane.xlu0 %949 }
 0x4d8   : > { %2076 = vpow2.f32 %v960_v53  ;;  %v956_v56 = vsub.f32 %v940_v39, %v950_v55  ;;  %1891 = vmatpush3.msra.mxu0 %v987_v54  ;;  %v1983_v53 = vpack.c.bf16 %v1787_v52, %v1785_v51  ;;  %v1784_v54 = vld [vmem:[%s2633_s8 + $0x60] sm:$0xff]  ;;  %v1786_v55 = vld [vmem:[%s2633_s8 + $0x70] sm:$0xff] }
 0x4d9   : > { %1900 = vmatprep.subr.mxu0 %v2164_v9 }
 0x4da   : > { %v962_v57 = vmul.f32 1.442695, %v956_v56  ;;  %v1985_v56 = vpack.c.bf16 %v1786_v55, %v1784_v54 }
 0x4dc   : > { %2078 = vpow2.f32 %v962_v57 }
 0x4dd   : > { %v953_v18 = vpop.xlane.xlu0 %952 }
 0x4de   : > { %v957_v58 = vsub.f32 %v941_v44, %v953_v18 }
 0x4e0   : > { %v964_v59 = vmul.f32 1.442695, %v957_v58 }
 0x4e2   : > { %v2077_v60 = vpop.eup %2076  ;;  %2080 = vpow2.f32 %v964_v59 }
 0x4e3   : > { %v969_v61 = vsel %vm624_vm3, %v2077_v60, 0.0 }
 0x4e4   : > { %970 = vadd.xlane.f32.xlu0 %v969_v61 }
 0x4e6   : > { %v2079_v62 = vpop.eup %2078 }
 0x4e7   : > { %v972_v63 = vsel %vm624_vm3, %v2079_v62, 0.0 }
 0x4e8   : > { %973 = vadd.xlane.f32.xlu1 %v972_v63  ;;  %v1789_v63 = vld [vmem:[%s2634_s9 + $0x80] sm:$0xff] }
 0x4ec   : > { %v2081_v1 = vpop.eup %2080 }
 0x4ed   : > { %v975_v2 = vsel %vm624_vm3, %v2081_v1, 0.0 }
 0x4ee   : > { %976 = vadd.xlane.f32.xlu0 %v975_v2 }
 0x4f9   : > { %1138 = vrot.lane.b32.xlu1 %v2336_v20, %s2174_s18 }
 0x4fd   : > { %1214 = vrot.lane.b32.xlu1 %v2342_v22, %s2174_s18 }
 0x504   : > { %1062 = vrot.lane.b32.xlu0 %v2338_v21, %s2174_s18  ;;  %s2175_s18 = smov 8  }
 0x50c   : > { %v968_v3 = vpop.xlane.xlu1 %967 }
 0x50d   : > { %2082 = vrcp.f32 %v968_v3  ;;  %v1791_v3 = vld [vmem:[%s2634_s9 + $0x90] sm:$0xff] }
 0x517   : > { %v2083_v4 = vpop.eup %2082 }
 0x518   : > { %v982_v5 = vmul.f32 %v2083_v4, %v2075_v49  ;;  %v1782_v49 = vld [vmem:[%s2633_s8 + $0x50] sm:$0xff] }
 0x51a   : > { %1893 = vmatmul.mubr.msk.f32.vlgmr.msra.gmra.mrb[0].mxu0 %vm624_vm3, %v982_v5  ;;  %v1793_v5 = vld [vmem:[%s2634_s9 + $0xa0] sm:$0xff] }
 0x51b   : > { %1902 = vmatprep.mubr.msk.f32.mxu0 %vm2163_vm1, %v2164_v9 }
 0x571   : > { %v971_v7 = vpop.xlane.xlu0 %970 }
 0x572   : > { %2084 = vrcp.f32 %v971_v7  ;;  %v1794_v7 = vld [vmem:[%s2634_s9 + $0xa8] sm:$0xff] }
 0x575   : > { %v974_v8 = vpop.xlane.xlu1 %973 }
 0x576   : > { %2086 = vrcp.f32 %v974_v8  ;;  %v1994_v8 = vpack.c.bf16 %v1794_v7, %v1793_v5 }
 0x579   : > { %v1139_v20 = vpop.permute.xlu1 %1138 }
 0x57a   : > { %1901 = vmatpush3.msra.mxu0 %v1139_v20  ;;  %v1795_v20 = vld [vmem:[%s2634_s9 + $0xb0] sm:$0xff] }
 0x57b   : > { %v977_v10 = vpop.xlane.xlu0 %976  ;;  %1973 = vmatprep.subr.bf16.mxu0 %v2162_v6 }
 0x57c   : > { %v2085_v22 = vpop.eup %2084  ;;  %2088 = vrcp.f32 %v977_v10  ;;  %v1796_v10 = vld [vmem:[%s2634_s9 + $0xb8] sm:$0xff] }
 0x57d   : > { %v983_v21 = vmul.f32 %v2085_v22, %v2077_v60  ;;  %v1215_v14 = vpop.permute.xlu1 %1214  ;;  %v1779_v60 = vld [vmem:[%s2632_s7 + $0x1] ss:$0 sm:$0xff]  ;;  %v1997_v22 = vpack.c.bf16 %v1796_v10, %v1795_v20 }
 0x57f   : > { %v1063_v11 = vpop.permute.xlu0 %1062 }
 0x580   : > { %v2087_v12 = vpop.eup %2086  ;;  %1896 = vmatpush3.msra.mxu1 %v1063_v11  ;;  %v1798_v11 = vld [vmem:[%s2634_s9 + $0xc8] sm:$0xff] }
 0x581   : > { %v984_v13 = vmul.f32 %v2087_v12, %v2079_v62  ;;  %1898 = vmatmul.mubr.msk.f32.vlgmr.msra.gmra.mrb[10].mxu1 %vm624_vm3, %v983_v21  ;;  %1905 = vmatprep.subr.mxu1 %v2164_v9  ;;  %v1797_v21 = vld [vmem:[%s2634_s9 + $0xc0] sm:$0xff] }
 0x582   : > { %1906 = vmatpush3.msra.mxu1 %v1215_v14  ;;  %1907 = vmatprep.mubr.msk.f32.mxu1 %vm2163_vm1, %v2164_v9  ;;  %v2000_v12 = vpack.c.bf16 %v1798_v11, %v1797_v21  ;;  %v1800_v14 = vld [vmem:[%s2634_s9 + $0xd8] sm:$0xff] }
 0x583   : > { %1903 = vmatmul.mubr.msk.f32.vlgmr.msra.gmra.mrb[2].mxu0 %vm624_vm3, %v984_v13  ;;  %1980 = vmatprep.subr.bf16.mxu1 %v1979_v48  ;;  %v1799_v13 = vld [vmem:[%s2634_s9 + $0xd0] sm:$0xff] }
 0x584   : > { %1918 = vmatprep.mubr.msk.f32.mxu0 %vm2163_vm1, %v2164_v9  ;;  %1975 = vmatpush3.bf16.msra.mxu0 %v1974_v26  ;;  %v2009_v26 = vpack.c.bf16 %v1804_v25, %v1803_v23 }
 0x585   : > { %1976 = vmatprep.subr.bf16.mxu0 %v2162_v6 }
 0x586   : > { %v2089_v15 = vpop.eup %2088 }
 0x587   : > { %v985_v16 = vmul.f32 %v2089_v15, %v2081_v1  ;;  %v1790_v1 = vld [vmem:[%s2634_s9 + $0x88] sm:$0xff]  ;;  %v2003_v15 = vpack.c.bf16 %v1800_v14, %v1799_v13 }
 0x588   : > { %1978 = vmatpush3.bf16.msra.mxu0 %v1977_v30  ;;  %v1988_v2 = vpack.c.bf16 %v1790_v1, %v1789_v63 }
 0x589   : > { %1908 = vmatmul.mubr.msk.f32.vlgmr.msra.gmra.mrb[12].mxu1 %vm624_vm3, %v985_v16  ;;  %1987 = vmatprep.subr.bf16.mxu0 %v2162_v6  ;;  %v1801_v16 = vld [vmem:[%s2634_s9 + $0xe0] sm:$0xff] }
 0x58a   : > { %1479 = vmatprep.mubr.f32.mxu1 %v2164_v9 }
 0x5ed   : > { %v1058_v17 = vpop.f32.mrb[0].mxu0 }
 0x5ee   : > { %v1894_v19 = vpop.f32.mrb[1].mxu0 }
 0x654   : > { %v1134_v31 = vpop.f32.mrb[10].mxu1 }
 0x655   : > { %1291 = vrot.lane.b32.xlu0 %v1134_v31, %s2175_s18  ;;  %v1899_v28 = vpop.f32.mrb[11].mxu1  ;;  %s2585_s18 = scalar_lea.hbm %s2637_s12, %s1808_s17 }
 0x656   : > { %v1210_v24 = vpop.f32.mrb[2].mxu0 }
 0x657   : > { %1295 = vrot.lane.b32.xlu1 %v1210_v24, %s2176_s19  ;;  %v1904_v32 = vpop.f32.mrb[3].mxu0  ;;  %s1676_s19 = scalar_lea.sflag [#allocation3], %s402_s26 }
 0x65c   : > { %v1286_v33 = vpop.f32.mrb[12].mxu1 }
 0x65d   : > { %1299 = vrot.lane.b32.xlu0 %v1286_v33, %s2177_s20  ;;  %v1909_v34 = vpop.f32.mrb[13].mxu1  ;;  %s2098_s20 = scalar_lea.vmem %s2580_s15, 128 }
 0x65e   : > { %p2099_p11 = scmp.ne.s32.totalorder %s2580_s15, %s2098_s20  ;;  %p2106_p1 = scmp.lt.s32.totalorder %s2104_s1, %s2098_s20 }
 0x660   : > { %p2100_p12 = pnand %p2099_p11, %p2282_p5  ;;  %p2107_p2 = por %p2106_p1, %p2105_p0 }
 0x662   : > { %p2101_p13 = pneg %p2100_p12 }
 0x664   : > { %p2108_p3 = pnand %p2107_p2, %p2101_p13 }
 0x6c7   : > { %v1292_v35 = vpop.permute.xlu0 %1291 }
 0x6c8   : > { %v1302_v36 = vsel %vm624_vm3, %v1058_v17, %v1292_v35  ;;  %v1802_v17 = vld [vmem:[%s2634_s9 + $0xe8] sm:$0xff] }
 0x6c9   : > { %v1296_v37 = vpop.permute.xlu1 %1295  ;;  %v2006_v19 = vpack.c.bf16 %v1802_v17, %v1801_v16 }
 0x6ca   : > { %v1304_v38 = vsel %vm1303_vm4, %v1302_v36, %v1296_v37 }
 0x6cf   : > { %v1300_v39 = vpop.permute.xlu0 %1299 }
 0x6d0   : > { %v1306_v40 = vsel %vm1305_vm5, %v1304_v38, %v1300_v39 }
 0x6d1   : > { %1919 = vmatmul.mubr.msk.f32.vlgmr.msra.gmra.mrb[4].mxu0 %vm416_vm0, %v1306_v40  ;;  %v1597_v40 = vld [vmem:[%s2636_s11] sm:$0xff] }
 0x6d2   : > { %1953 = vmatprep.mubr.msk.f32.mxu0 %vm2163_vm1, %v2164_v9  ;;  %1989 = vmatpush3.bf16.msra.mxu0 %v1988_v2 }
 0x6d3   : > { %1990 = vmatprep.subr.bf16.mxu0 %v2162_v6 }
 0x7a4   : > { %v1381_v41 = vpop.f32.mrb[4].mxu0 }
 0x7a5   : > { %v2467_v42 = vadd.f32 %v1381_v41, %v2297_v0  ;;  %v1920_v43 = vpop.f32.mrb[5].mxu0  ;;  %v1780_v0 = vld [vmem:[%s2633_s8 + $0x40] sm:$0xff]  ;;  %v1598_v41 = vld [vmem:[%s2636_s11 + $0x8] sm:$0xff] }
 0x7a6   : > { %v1981_v50 = vpack.c.bf16 %v1782_v49, %v1780_v0  ;;  %v2012_v43 = vpack.c.bf16 %v1598_v41, %v1597_v40 }
 0x7a7   : > { %v1388_v44 = vmul.f32 %v2467_v42, %v2467_v42 }
 0x7a8   : > { %1982 = vmatpush1.bf16.msra.mxu1 %v1981_v50 }
 0x7a9   : > { %v1389_v45 = vsel %vm416_vm0, %v1388_v44, 0.0  ;;  %1984 = vmatprep.subr.bf16.mxu1 %v1983_v53  ;;  %v1600_v44 = vld [vmem:[%s2636_s11 + $0x18] sm:$0xff] }
 0x7aa   : > { %1390 = vadd.xlane.f32.xlu1 %v1389_v45 }
 0x7ac   : > { %1986 = vmatpush1.bf16.msra.mxu1 %v1985_v56 }
 0x7ad   : > { %2011 = vmatprep.subr.bf16.mxu1 %v2162_v6 }
 0x837   : > { %v1391_v57 = vpop.xlane.xlu1 %1390 }
 0x838   : > { %v1392_v18 = vmul.f32 0.03125, %v1391_v57 }
 0x83a   : > { %v1393_v58 = vadd.f32 1e-05, %v1392_v18 }
 0x83c   : > { %2090 = vrsqrt.f32 %v1393_v58 }
 0x846   : > { %v2091_v59 = vpop.eup %2090 }
 0x847   : > { %v1395_v61 = vmul.f32 %v2091_v59, %v2467_v42 }
 0x849   : > { %v1402_v62 = vmul.f32 %v1779_v60, %v1395_v61 }
 0x84b   : > { %1788 = vmatmul.mubr.msk.f32.vlgmr.msra.gmra.mrb[14].mxu1 %vm416_vm0, %v1402_v62 }
 0x84c   : > { %1964 = vmatprep.mubr.msk.f32.mxu1 %vm2163_vm1, %v2164_v9  ;;  %v1792_v9 = vld [vmem:[%s2634_s9 + $0x98] sm:$0xff]  ;;  %2013 = vmatpush3.bf16.msra.mxu1 %v2012_v43 }
 0x84d   : > { %v1991_v4 = vpack.c.bf16 %v1792_v9, %v1791_v3  ;;  %2014 = vmatprep.subr.bf16.mxu1 %v2162_v6 }
 0x84f   : > { %1992 = vmatpush3.bf16.msra.mxu0 %v1991_v4 }
 0x850   : > { %1993 = vmatprep.subr.bf16.mxu0 %v2162_v6 }
 0x853   : > { %1995 = vmatpush3.bf16.msra.mxu0 %v1994_v8 }
 0x854   : > { %1996 = vmatprep.subr.bf16.mxu0 %v2162_v6 }
 0x857   : > { %1998 = vmatpush3.bf16.msra.mxu0 %v1997_v22 }
 0x858   : > { %1999 = vmatprep.subr.bf16.mxu0 %v2162_v6 }
 0x85b   : > { %2001 = vmatpush3.bf16.msra.mxu0 %v2000_v12 }
 0x85c   : > { %2002 = vmatprep.subr.bf16.mxu0 %v2162_v6 }
 0x85f   : > { %2004 = vmatpush3.bf16.msra.mxu0 %v2003_v15 }
 0x860   : > { %2005 = vmatprep.subr.bf16.mxu0 %v2162_v6 }
 0x863   : > { %2007 = vmatpush3.bf16.msra.mxu0 %v2006_v19 }
 0x864   : > { %2008 = vmatprep.subr.bf16.mxu0 %v2162_v6  ;;  %v1805_v6 = vld [vmem:[%s2635_s10] ss:$0 sm:$0xff] }
 0x867   : > { %2010 = vmatpush3.bf16.msra.mxu0 %v2009_v26 }
 0x91e   : > { %v1481_v27 = vpop.f32.mrb[14].mxu1 }
 0x91f   : > { %v1486_v29 = vsub.f32 0.0, %v1481_v27  ;;  %v1483_v30 = vpop.f32.mrb[15].mxu1 }
 0x921   : > { %v1487_v31 = vmul.f32 1.442695, %v1486_v29 }
 0x923   : > { %2092 = vpow2.f32 %v1487_v31 }
 0x92d   : > { %v2093_v28 = vpop.eup %2092 }
 0x92e   : > { %v1489_v24 = vadd.f32 1.0, %v2093_v28 }
 0x930   : > { %2094 = vrcp.f32 %v1489_v24 }
 0x93a   : > { %v2095_v32 = vpop.eup %2094 }
 0x93b   : > { %v1491_v33 = vmul.f32 %v2095_v32, %v1481_v27 }
 0x93d   : > { %v1492_v34 = vmul.f32 %v1491_v33, %v1483_v30 }
 0x93f   : > { %1954 = vmatmul.mubr.f32.vlgmr.msra.gmra.mrb[6].mxu0 %v1492_v34 }
 0xa12   : > { %v1576_v35 = vpop.f32.mrb[6].mxu0 }
 0xa13   : > { %v1580_v36 = vadd.f32 %v1576_v35, %v2467_v42  ;;  %v1955_v37 = vpop.f32.mrb[7].mxu0  ;;  %v1599_v42 = vld [vmem:[%s2636_s11 + $0x10] sm:$0xff] }
 0xa14   : > { %v2015_v45 = vpack.c.bf16 %v1600_v44, %v1599_v42 }
 0xa15   : > { %v1582_v38 = vmul.f32 %v1580_v36, %v1580_v36 }
 0xa16   : > { %2016 = vmatpush3.bf16.msra.mxu1 %v2015_v45 }
 0xa17   : > { %v1583_v39 = vsel %vm416_vm0, %v1582_v38, 0.0 }
 0xa18   : > { %1584 = vadd.xlane.f32.xlu0 %v1583_v39 }
 0xaa5   : > { %v1585_v46 = vpop.xlane.xlu0 %1584 }
 0xaa6   : > { %v1586_v47 = vmul.f32 0.03125, %v1585_v46 }
 0xaa8   : > { %v1587_v48 = vadd.f32 1e-05, %v1586_v47 }
 0xaaa   : > { %2096 = vrsqrt.f32 %v1587_v48 }
 0xab4   : > { %v2097_v0 = vpop.eup %2096 }
 0xab5   : > { %v1589_v49 = vmul.f32 %v2097_v0, %v1580_v36 }
 0xab7   : > { %v1596_v50 = vmul.f32 %v1805_v6, %v1589_v49 }
 0xab9   : > { %1965 = vmatmul.mubr.msk.f32.vlgmr.msra.gmra.mrb[16].mxu1 %vm416_vm0, %v1596_v50 }
 0xb8c   : > { %v1670_v51 = vpop.f32.mrb[16].mxu1 }
 0xb8d   : > { %1674 = vst [vmem:[%s404_s29] sm:$0xff] %v1670_v51  ;;  %v1966_v52 = vpop.f32.mrb[17].mxu1 }
 0xb8e   : > { %2111 = shalt.err (!%p2108_p3)
}
 0xb8f   : > { %s2112_s26 = scalar_lea.hbm %s2585_s18, 128  ;;  %s2116_s16 = scalar_lea.hbm %s2637_s12, 256 }
 0xb90   : > { %p2113_p4 = scmp.ne.s32.totalorder %s2585_s18, %s2112_s26  ;;  %p2117_p9 = scmp.lt.u32.totalorder %s2585_s18, %s2637_s12 }
 0xb91   : > { %p2118_p10 = scmp.lt.u32.totalorder %s2116_s16, %s2112_s26  ;;  %p2120_p12 = scmp.lt.u32.totalorder %s2112_s26, %s2585_s18 }
 0xb92   : > { %p2114_p7 = pnand %p2113_p4, %p2282_p5 }
 0xb93   : > { %p2119_p11 = por %p2118_p10, %p2117_p9 }
 0xb94   : > { %p2115_p8 = pneg %p2114_p7 }
 0xb95   : > { %p2121_p13 = por %p2120_p12, %p2119_p11 }
 0xb97   : > { %p2122_p0 = pnand %p2121_p13, %p2115_p8 }
 0xb99   : > { %2125 = shalt.err (!%p2122_p0)
}
 0xb9a   : > { %2017 = dma.vmem_to_hbm [thread:$0]  (%p2282_p5), %s2580_s15, 128, %s2585_s18, %s1676_s19  }
 0xb9b PF: > { %p2023_p1 = scmp.ge.s32.totalorder %s2160_s24, 2  ;;  %s1701_s1 = sand.u32 1, %s2148_s21  }
 0xb9c   : > { %s1702_s20 = scalar_lea.sflag [#allocation3], %s1701_s1 }
 0xb9d   : > { %p2020_p2 = pnand %p2023_p1, %p2286_p6 }
 0xb9f   : > { %2143 = dma.done.wait (!%p2020_p2), %s1702_s20, 128  }
 0xba0   : > { %2145 = vsyncadd (!%p2020_p2), %s1702_s20, 4294967168  ;;  %p22_p3 = scmp.ge.s32.totalorder %s2269_s27, 4   ;;  %s2644_s21 = smov %s2152_s22 }
 0xba1   : > { %s2645_s22 = smov %s2156_s23  ;;  %s2646_s23 = smov %s2280_s30 }
 0xba2   : > { %s2647_s24 = smov %s2269_s27  ;;  %24 = sbr.rel (!%p22_p3) target bundleno = 6 (0x6), region = 109 }
 0xba9   :  { %1707 = vsyncpa [#allocation3], 1 }
 0xbaa   :  { %1709 = vsyncpa [#allocation3 + $0x1], 1 }

</bundles_post_ra>
